<compile_context>
chip_gen: v5e
topology: v5e:2x2
jax: 0.10.0
libtpu: 0.0.40
codegen_flags: <defaults>
</compile_context>

<pallas_src>
import jax
import jax.numpy as jnp
from jax import lax
from jax.experimental import pallas as pl
from jax.experimental.pallas import tpu as pltpu


_VMEM_TILE_BUDGET = 24 * 1024 * 1024   # stay well under v7x's 64 MiB physical VMEM
_TILE_CANDIDATES = (512, 256, 128, 64, 32, 16, 8)


def _proto_lse_kernel(q_ref, a_ref, asq_ref, lse_ref, m_sc, l_sc):
    """Per-row logsumexp of shifted logits S_ij = 2 q_i . a_j - ||a_j||^2.

    grid = (row tiles [parallel], column tiles [arbitrary reduction]).
    Online logsumexp across column tiles; with a single column step (anchors
    VMEM-resident) this degenerates to the exact one-shot logsumexp.
    """
    j = pl.program_id(1)

    @pl.when(j == 0)
    def _init():
        m_sc[...] = jnp.full_like(m_sc, -jnp.inf)
        l_sc[...] = jnp.zeros_like(l_sc)

    # MXU: q @ a^T, contracting the shared D axis directly (no transpose).
    dots = lax.dot_general(
        q_ref[...], a_ref[...],
        dimension_numbers=(((1,), (1,)), ((), ())),
        preferred_element_type=jnp.float32)                # (TM, TN) f32
    logits = 2.0 * dots - asq_ref[...]                     # (1, TN) broadcasts

    m_prev = m_sc[...]
    m_new = jnp.maximum(m_prev, jnp.max(logits, axis=-1, keepdims=True))
    l_sc[...] = (jnp.exp(m_prev - m_new) * l_sc[...]
                 + jnp.sum(jnp.exp(logits - m_new), axis=-1, keepdims=True))
    m_sc[...] = m_new

    @pl.when(j == pl.num_programs(1) - 1)
    def _finalize():
        lse_ref[...] = m_sc[...] + jnp.log(l_sc[...])


def _divisor_tile(B, candidates):
    for t in candidates:
        if t <= B and B % t == 0:
            return t
    return B


def _vmem_need(tm, tn, B, D, itemsize):
    a_bufs = 1 if tn == B else 2                    # resident anchors: single buffer
    return (2 * tm * D * itemsize                   # queries (double-buffered)
            + a_bufs * tn * D * itemsize            # anchors
            + a_bufs * max(tn, 128) * 4             # ||a||^2 row (lane-padded)
            + 4 * tm * 4                            # output + m/l scratch
            + 2 * tm * tn * 4)                      # f32 logits + exp temporaries


def _pick_tiles(B, D, itemsize):
    tm = _divisor_tile(B, _TILE_CANDIDATES)
    if B // tm < 2:                                 # >= 2 row tiles for v7x megacore
        tm = _divisor_tile(B, tuple(t for t in _TILE_CANDIDATES if t < tm))
    if _vmem_need(tm, B, B, D, itemsize) <= _VMEM_TILE_BUDGET:
        return tm, B                                # anchors fully VMEM-resident
    tn = _divisor_tile(B, (512, 256, 128))          # lane-aligned column tiles
    while _vmem_need(tm, tn, B, D, itemsize) > _VMEM_TILE_BUDGET and tm % 16 == 0:
        tm //= 2
    return tm, tn


def proto_loss(x, label=None, *, row_tile=None, col_tile=None,
               matmul_dtype=jnp.bfloat16):
    """Prototypical-network loss. x: (B, V, D), V >= 2. Returns scalar f32.

    `label` is ignored (the reference module always uses arange(B)).
    `matmul_dtype=jnp.float32` gives exact f32 parity at lower MXU throughput.
    """
    B, V, D = x.shape
    assert V >= 2, "need at least one query view and one support view"
    del label

    xf = x.astype(jnp.float32)
    q = xf[:, 0, :]                                       # queries      (B, D)
    a = (jnp.sum(xf, axis=1) - q) * (1.0 / (V - 1))       # support mean (B, D)

    # MXU operands (bf16 by default: ~2-4x MXU throughput, half the DMA).
    qm = q.astype(matmul_dtype)
    am = a.astype(matmul_dtype)
    af = am.astype(jnp.float32)                           # rounded anchors, f32
    a_sq = jnp.sum(af * af, axis=-1)[None, :]             # (1, B) f32
    # True-class (diagonal) shifted logit, from the same rounded operands.
    diag = 2.0 * jnp.sum(qm.astype(jnp.float32) * af, axis=-1) - a_sq[0]   # (B,)

    itemsize = jnp.dtype(matmul_dtype).itemsize
    if row_tile is None or col_tile is None:
        auto_tm, auto_tn = _pick_tiles(B, D, itemsize)
        tm = auto_tm if row_tile is None else row_tile
        tn = auto_tn if col_tile is None else col_tile
    else:
        tm, tn = row_tile, col_tile
    assert B % tm == 0 and (tm % 8 == 0 or tm == B), (B, tm)
    assert B % tn == 0 and (tn % 128 == 0 or tn == B), (B, tn)

    nt_m, nt_n = B // tm, B // tn
    need = _vmem_need(tm, tn, B, D, itemsize)
    vmem_limit = int(min(56 * 1024 * 1024, max(32 * 1024 * 1024, 2 * need)))

    a_passes = 1 if tn == B else nt_m                     # anchor re-stream count
    cost = pl.CostEstimate(
        flops=2 * B * B * D,
        transcendentals=B * B,
        bytes_accessed=int(B * D * itemsize               # queries, once
                           + a_passes * B * D * itemsize  # anchors
                           + a_passes * B * 4             # ||a||^2 row
                           + B * 4))                      # lse output

    lse = pl.pallas_call(
        _proto_lse_kernel,
        out_shape=jax.ShapeDtypeStruct((B, 1), jnp.float32),
        grid_spec=pltpu.PrefetchScalarGridSpec(
            num_scalar_prefetch=0,
            grid=(nt_m, nt_n),
            in_specs=[
                # queries: row tile i (constant across j -> fetched once per row tile)
                pl.BlockSpec((tm, D), lambda i, j: (i, 0)),
                # anchors: column tile j (constant block when tn == B -> resident)
                pl.BlockSpec((tn, D), lambda i, j: (j, 0)),
                # ||a||^2: lane-dense (1, TN) row
                pl.BlockSpec((1, tn), lambda i, j: (0, j)),
            ],
            out_specs=pl.BlockSpec((tm, 1), lambda i, j: (i, 0)),
            scratch_shapes=[
                pltpu.VMEM((tm, 1), jnp.float32),   # running row max
                pltpu.VMEM((tm, 1), jnp.float32),   # running row sum-exp
            ],
        ),
        compiler_params=pltpu.CompilerParams(
            dimension_semantics=("parallel", "arbitrary"),
            vmem_limit_bytes=vmem_limit),
        cost_estimate=cost,
    )(qm, am, a_sq)

    # CrossEntropy with labels arange(B), reduction='mean'.
    return jnp.mean(lse[:, 0] - diag)


# ----------------------------- references -----------------------------------

def _ref_loss_f32(x):
    xf = x.astype(jnp.float32)
    q = xf[:, 0, :]
    a = jnp.mean(xf[:, 1:, :], axis=1)
    d2 = jnp.sum((q[:, None, :] - a[None, :, :]) ** 2, axis=-1)
    logits = -d2
    return jnp.mean(jax.nn.logsumexp(logits, axis=-1) - jnp.diag(logits))


def _ref_loss_rounded(x, dt):
    # Same math as the kernel path, with operands rounded to the MXU dtype.
    xf = x.astype(jnp.float32)
    q = xf[:, 0, :]
    a = (jnp.sum(xf, axis=1) - q) / (x.shape[1] - 1)
    qb = q.astype(dt).astype(jnp.float32)
    ab = a.astype(dt).astype(jnp.float32)
    logits = 2.0 * (qb @ ab.T) - jnp.sum(ab * ab, axis=-1)[None, :]
    return jnp.mean(jax.nn.logsumexp(logits, axis=-1) - jnp.diag(logits))


if __name__ == "__main__":
    key = jax.random.PRNGKey(0)
    k1, k2 = jax.random.split(key)

    # Test 1: small shape -> anchors resident, grid (2, 1).
    B, V, D = 16, 3, 32
    x = jax.random.normal(k1, (B, V, D), dtype=jnp.float32)
    loss = proto_loss(x)
    jax.block_until_ready(loss)
    ref_r = _ref_loss_rounded(x, jnp.bfloat16)
    ref_f = _ref_loss_f32(x)
    assert jnp.allclose(loss, ref_r, rtol=2e-3, atol=2e-3), (loss, ref_r)
    assert jnp.allclose(loss, ref_f, rtol=5e-2, atol=5e-1), (loss, ref_f)

    # Test 2: larger batch, forced column tiling -> exercises the online
    # logsumexp across column tiles (grid (4, 2)), plus the auto (resident) path.
    B2, V2, D2 = 256, 3, 32
    x2 = jax.random.normal(k2, (B2, V2, D2), dtype=jnp.float32)
    loss2_tiled = proto_loss(x2, row_tile=64, col_tile=128)
    loss2_auto = proto_loss(x2)
    jax.block_until_ready((loss2_tiled, loss2_auto))
    ref2 = _ref_loss_rounded(x2, jnp.bfloat16)
    assert jnp.allclose(loss2_tiled, ref2, rtol=2e-3, atol=2e-3), (loss2_tiled, ref2)
    assert jnp.allclose(loss2_auto, ref2, rtol=2e-3, atol=2e-3), (loss2_auto, ref2)

    print("KERNEL_OK")
</pallas_src>

<mosaic_0001>
module attributes {stable_mosaic.version = 11 : i64} {
  func.func @_proto_lse_kernel(%arg0: i32, %arg1: i32, %arg2: memref<8x32xbf16, #tpu.memory_space<vmem>>, %arg3: memref<16x32xbf16, #tpu.memory_space<vmem>>, %arg4: memref<1x16xf32, #tpu.memory_space<vmem>>, %arg5: memref<8x1xf32, #tpu.memory_space<vmem>>, %arg6: memref<8x1xf32, #tpu.memory_space<vmem>>, %arg7: memref<8x1xf32, #tpu.memory_space<vmem>>) attributes {dimension_semantics = [#tpu.dimension_semantics<parallel>, #tpu.dimension_semantics<arbitrary>], iteration_bounds = array<i64: 2, 1>, scalar_prefetch = 0 : i64, scratch_operands = 2 : i64, tpu.core_type = #tpu.core_type<tc>, window_params = [{transform_indices = @transform_0, window_bounds = array<i64: 8, 32>}, {transform_indices = @transform_1, window_bounds = array<i64: 16, 32>}, {transform_indices = @transform_2, window_bounds = array<i64: 1, 16>}, {transform_indices = @transform_3, window_bounds = array<i64: 8, 1>}]} {
    %c0_i32 = arith.constant 0 : i32
    %0 = arith.cmpi eq, %arg1, %c0_i32 : i32
    %1 = arith.extui %0 : i1 to i32
    %c0_i32_0 = arith.constant 0 : i32
    %2 = arith.cmpi ne, %1, %c0_i32_0 : i32
    scf.if %2 {
      %cst_19 = arith.constant 0xFF800000 : f32
      %30 = vector.broadcast %cst_19 : f32 to vector<8x1xf32>
      %c0_20 = arith.constant 0 : index
      %c0_21 = arith.constant 0 : index
      %31 = vector.load %arg6[%c0_20, %c0_21] : memref<8x1xf32, #tpu.memory_space<vmem>>, vector<8x1xf32>
      tpu.vector_store %arg6[%c0_20, %c0_21], %30 {strides = array<i32>} : memref<8x1xf32, #tpu.memory_space<vmem>>, vector<8x1xf32>,
      %cst_22 = arith.constant 0.000000e+00 : f32
      %32 = vector.broadcast %cst_22 : f32 to vector<8x1xf32>
      %c0_23 = arith.constant 0 : index
      %c0_24 = arith.constant 0 : index
      %33 = vector.load %arg7[%c0_23, %c0_24] : memref<8x1xf32, #tpu.memory_space<vmem>>, vector<8x1xf32>
      tpu.vector_store %arg7[%c0_23, %c0_24], %32 {strides = array<i32>} : memref<8x1xf32, #tpu.memory_space<vmem>>, vector<8x1xf32>,
    } else {
    }
    %c0 = arith.constant 0 : index
    %c0_1 = arith.constant 0 : index
    %3 = vector.load %arg2[%c0, %c0_1] : memref<8x32xbf16, #tpu.memory_space<vmem>>, vector<8x32xbf16>
    %c0_2 = arith.constant 0 : index
    %c0_3 = arith.constant 0 : index
    %4 = vector.load %arg3[%c0_2, %c0_3] : memref<16x32xbf16, #tpu.memory_space<vmem>>, vector<16x32xbf16>
    %cst = arith.constant dense<0.000000e+00> : vector<8x16xf32>
    %5 = tpu.matmul %3, %4, %cst {dimension_numbers = #tpu.dot_dimension_numbers<[1], [1], [0], [0], [0, 0, 1, 0], [], []>} : vector<8x32xbf16>, vector<16x32xbf16>, vector<8x16xf32> -> vector<8x16xf32>
    %cst_4 = arith.constant 2.000000e+00 : f32
    %6 = vector.broadcast %cst_4 : f32 to vector<8x16xf32>
    %7 = arith.mulf %6, %5 : vector<8x16xf32>
    %c0_5 = arith.constant 0 : index
    %c0_6 = arith.constant 0 : index
    %8 = vector.load %arg4[%c0_5, %c0_6] : memref<1x16xf32, #tpu.memory_space<vmem>>, vector<1x16xf32>
    %9 = vector.broadcast %8 : vector<1x16xf32> to vector<8x16xf32>
    %10 = arith.subf %7, %9 : vector<8x16xf32>
    %c0_7 = arith.constant 0 : index
    %c0_8 = arith.constant 0 : index
    %11 = vector.load %arg6[%c0_7, %c0_8] : memref<8x1xf32, #tpu.memory_space<vmem>>, vector<8x1xf32>
    %cst_9 = arith.constant dense<0xFF800000> : vector<8xf32>
    %12 = vector.multi_reduction <maximumf>, %10, %cst_9 [1] : vector<8x16xf32> to vector<8xf32>
    %13 = vector.shape_cast %12 : vector<8xf32> to vector<8x1xf32>
    %14 = arith.maximumf %11, %13 : vector<8x1xf32>
    %15 = arith.subf %11, %14 : vector<8x1xf32>
    %16 = math.exp %15 : vector<8x1xf32>
    %c0_10 = arith.constant 0 : index
    %c0_11 = arith.constant 0 : index
    %17 = vector.load %arg7[%c0_10, %c0_11] : memref<8x1xf32, #tpu.memory_space<vmem>>, vector<8x1xf32>
    %18 = arith.mulf %16, %17 : vector<8x1xf32>
    %19 = vector.broadcast %14 : vector<8x1xf32> to vector<8x16xf32>
    %20 = arith.subf %10, %19 : vector<8x16xf32>
    %21 = math.exp %20 : vector<8x16xf32>
    %cst_12 = arith.constant dense<0.000000e+00> : vector<8xf32>
    %22 = vector.multi_reduction <add>, %21, %cst_12 [1] : vector<8x16xf32> to vector<8xf32>
    %23 = vector.shape_cast %22 : vector<8xf32> to vector<8x1xf32>
    %24 = arith.addf %18, %23 : vector<8x1xf32>
    %c0_13 = arith.constant 0 : index
    %c0_14 = arith.constant 0 : index
    %25 = vector.load %arg7[%c0_13, %c0_14] : memref<8x1xf32, #tpu.memory_space<vmem>>, vector<8x1xf32>
    tpu.vector_store %arg7[%c0_13, %c0_14], %24 {strides = array<i32>} : memref<8x1xf32, #tpu.memory_space<vmem>>, vector<8x1xf32>,
    %c0_15 = arith.constant 0 : index
    %c0_16 = arith.constant 0 : index
    %26 = vector.load %arg6[%c0_15, %c0_16] : memref<8x1xf32, #tpu.memory_space<vmem>>, vector<8x1xf32>
    tpu.vector_store %arg6[%c0_15, %c0_16], %14 {strides = array<i32>} : memref<8x1xf32, #tpu.memory_space<vmem>>, vector<8x1xf32>,
    %c0_i32_17 = arith.constant 0 : i32
    %27 = arith.cmpi eq, %arg1, %c0_i32_17 : i32
    %28 = arith.extui %27 : i1 to i32
    %c0_i32_18 = arith.constant 0 : i32
    %29 = arith.cmpi ne, %28, %c0_i32_18 : i32
    scf.if %29 {
      %c0_19 = arith.constant 0 : index
      %c0_20 = arith.constant 0 : index
      %30 = vector.load %arg6[%c0_19, %c0_20] : memref<8x1xf32, #tpu.memory_space<vmem>>, vector<8x1xf32>
      %c0_21 = arith.constant 0 : index
      %c0_22 = arith.constant 0 : index
      %31 = vector.load %arg7[%c0_21, %c0_22] : memref<8x1xf32, #tpu.memory_space<vmem>>, vector<8x1xf32>
      %32 = math.log %31 : vector<8x1xf32>
      %33 = arith.addf %30, %32 : vector<8x1xf32>
      %c0_23 = arith.constant 0 : index
      %c0_24 = arith.constant 0 : index
      %34 = vector.load %arg5[%c0_23, %c0_24] : memref<8x1xf32, #tpu.memory_space<vmem>>, vector<8x1xf32>
      tpu.vector_store %arg5[%c0_23, %c0_24], %33 {strides = array<i32>} : memref<8x1xf32, #tpu.memory_space<vmem>>, vector<8x1xf32>,
    } else {
    }
    return
  }
  func.func @transform_0(%arg0: i32, %arg1: i32) -> (i32, i32) {
    %c0_i32 = arith.constant 0 : i32
    %c0_i32_0 = arith.constant 0 : i32
    return %arg0, %c0_i32 : i32, i32
  }
  func.func @transform_1(%arg0: i32, %arg1: i32) -> (i32, i32) {
    %c0_i32 = arith.constant 0 : i32
    %c0_i32_0 = arith.constant 0 : i32
    return %arg1, %c0_i32 : i32, i32
  }
  func.func @transform_2(%arg0: i32, %arg1: i32) -> (i32, i32) {
    %c0_i32 = arith.constant 0 : i32
    %c0_i32_0 = arith.constant 0 : i32
    return %c0_i32, %arg1 : i32, i32
  }
  func.func @transform_3(%arg0: i32, %arg1: i32) -> (i32, i32) {
    %c0_i32 = arith.constant 0 : i32
    %c0_i32_0 = arith.constant 0 : i32
    return %arg0, %c0_i32 : i32, i32
  }
}

</mosaic_0001>

<bundles_post_ra>
// kernel: tpu_custom_call.1
= control target key start
LH: loop header
LB: loop body
LE: loop exit
PB: predicated region body
PF: predicated region fallthrough
CT: control target
= control target key end

     0   :  { %8 = vsyncpa [#allocation5], 0  ;;  %s779_s0 = inlined_call_operand.hbm [shape: bf16[16,32], index: 0, kind: input, shape index: {}]   ;;  %s780_s1 = inlined_call_operand.hbm [shape: bf16[16,32], index: 1, kind: input, shape index: {}]   ;;  %s781_s2 = inlined_call_operand.vmem [shape: f32[1,16], index: 2, kind: input, shape index: {}]   ;;  %s782_s3 = inlined_call_operand.vmem [shape: f32[16,1], index: 3, kind: output, shape index: {}]  }
   0x1   :  { %10 = vsyncpa [#allocation5 + $0x1], 0 }
   0x2   :  { %11 = vsyncpa [#allocation7], 0  ;;  %s655_s12 = smov 0   ;;  %s657_s13 = smov 0  }
   0x3   :  { %s659_s14 = smov 0   ;;  %s661_s15 = smov 0  }
   0x4   :  { %s663_s16 = smov 0   ;;  %s665_s17 = smov 0  }
   0x5 LB: > { %s414_s18 = sadd.s32 4294967295, %s627_s17   ;;  %p416_p0 = scmp.ge.s32.totalorder %s627_s17, 1  ;;  %s627_s17 = sphi %s665_s17, %s17_s17   ;;  %s623_s16 = sphi %s663_s16, %s791_s16   ;;  %s619_s15 = sphi %s661_s15, %s790_s15   ;;  %s615_s14 = sphi %s659_s14, %s789_s14   ;;  %s611_s13 = sphi %s657_s13, %s788_s13   ;;  %s607_s12 = sphi %s655_s12, %s787_s12  }
   0x6   : > { %p687_p1 = scmp.eq.s32.totalorder %s414_s18, 0  ;;  %p138_p2 = scmp.lt.s32.totalorder %s627_s17, 3 }
   0x7   : > { %s152_s22 = sshll.u32 %s780_s1, 4  ;;  %s629_s24 = smov [#allocation6]   ;;  %s153_s22 = int_to_ptr.hbm [resolvable:$true] %s152_s22 }
   0x8   : > { %p695_p3 = pnand %p416_p0, %p138_p2  ;;  %s154_s25 = sshll.u32 %s629_s24, 4  ;;  %s155_s25 = int_to_ptr.vmem [resolvable:$true] %s154_s25 }
   0x9   : > { %s630_s26 = smov 64   ;;  %s631_s27 = smov 4  }
   0xa   : > { %p440_p4 = pneg %p695_p3  ;;  %s29_s28 = sadd.s32 1, %s623_s16 }
   0xb   : > { %p31_p6 = scmp.ge.s32.totalorder %s29_s28, 2  ;;  %p43_p7 = scmp.ne.s32.totalorder %s615_s14, %s611_s13 }
   0xc   : > { %p441_p5 = pnand %p440_p4, %p687_p1  ;;  %p44_p8 = scmp.eq.s32.totalorder %s627_s17, 0 }
   0xd   : > { %s793_s28 = smov (%p31_p6, %s29_s28), 0  ;;  %s36_s29 = sadd.s32 1, %s615_s14 }
   0xe   : > { %443 = dma.hbm_to_vmem [thread:$0]  (!%p441_p5), %s153_s22, 128, %s155_s25, [#allocation7], %s630_s26, %s630_s26, %s631_s27  }
   0xf   : > { %p49_p9 = scmp.ne.s32.totalorder %s611_s13, %s607_s12  ;;  %s33_s30 = ssub.s32 %s623_s16, %s793_s28 }
  0x10   : > { %p714_p10 = por %p44_p8, %p43_p7  ;;  %p34_p11 = scmp.eq.s32.totalorder %s33_s30, 0 }
  0x11   : > { %p720_p12 = por %p687_p1, %p49_p9  ;;  %s174_s6 = sand.u32 1, %s615_s14  }
  0x12   : > { %s421_s7 = sshll.u32 %s623_s16, 2  ;;  %p449_p13 = scmp.lt.s32.totalorder %s627_s17, 2 }
  0x13   : > { %s727_s8 = scalar_select %p34_p11, %s615_s14, %s36_s29  }
  0x14   : > { %s420_s9 = sshll.u32 %s174_s6, 2  ;;  %s182_s12 = scalar_lea.hbm %s779_s0, %s421_s7 }
  0x15   : > { %s184_s18 = sshll.u32 %s182_s12, 4  ;;  %s178_s20 = scalar_lea.vmem [#allocation4], %s420_s9  ;;  %s185_s18 = int_to_ptr.hbm [resolvable:$true] %s184_s18 }
  0x16   : > { %s186_s21 = sshll.u32 %s178_s20, 4  ;;  %p445_p0 = pnand %p449_p13, %p714_p10  ;;  %s187_s21 = int_to_ptr.vmem [resolvable:$true] %s186_s21 }
  0x17   : > { %s175_s22 = scalar_lea.sflag [#allocation5], %s174_s6  ;;  %195 = sbr.rel (%p695_p3) target bundleno = 554 (0x22a), region = 32 }
  0x18   : > { %447 = dma.hbm_to_vmem [thread:$0]  (!%p445_p0), %s185_s18, 64, %s187_s21, %s175_s22  }
  0x19   : > { %s197_s24 = sand.u32 (!%p695_p3), 1, %s611_s13  }
  0x1a   : > { %s423_s25 = sshll.u32 (!%p695_p3), %s197_s24, 2  ;;  %s198_s26 = scalar_lea.sflag (!%p695_p3), [#allocation5], %s197_s24 }
  0x1b   : > { %s201_s27 = scalar_lea.vmem (!%p695_p3), [#allocation4], %s423_s25 }
  0x1c   : > { %598 = dma.done.wait (%p720_p12), %s198_s26, 64  }
  0x1d   : > { %600 = vsyncadd (%p720_p12), %s198_s26, 4294967232 }
  0x1e   : > { %602 = dma.done.wait (%p687_p1), [#allocation7], 128  }
  0x1f   : > { %604 = vsyncadd (%p687_p1), [#allocation7], 4294967168  ;;  %vm256_vm0 = vcmask 261120   ;;  %v433_v0 = vld [vmem:[#allocation6] sm:$0xff]  ;;  %v248_v2 = vld [vmem:[%s201_s27] sm:$0xf] }
  0x20   : > { %v261_v1 = vsel %vm256_vm0, %v433_v0, 0  ;;  %vm245_vm1 = vcmask 7168   ;;  %v632_v3 = vmov -inf   ;;  %v506_v4 = vld [vmem:[%s781_s2] ss:$0 sm:$0xff]  ;;  %vm283_vm2 = vcmask 130048  }
  0x21   : > { %270 = vmatpush.bf16.xpose.msra.mxu0 %v261_v1  ;;  %246 = vst.msk [vmem:[#allocation2] sm:$0xff] %vm245_vm1, %v632_v3  ;;  %v633_v10 = vmov 0   ;;  %v634_v11 = vmov 0.0   ;;  %p236_p1 = scmp.lt.s32.totalorder %s619_s15, 1 }
  0x22   : > { %505 = vset.pattern.permute.xlu0 %v633_v10  ;;  %247 = vst.msk [vmem:[#allocation3] sm:$0xff] %vm245_vm1, %v634_v11 }
  0x23   : > { %s795_s15 = smov (!%p236_p1, %s619_s15), 1 }
  0x24   : > { %s425_s19 = sshll.u32 %s795_s15, 3 }
  0x25   : > { %s239_s5 = scalar_lea.vmem %s782_s3, %s425_s19 }
  0x28   : > { %430 = vmatmul.msk.bf16.vlgmr.msra.gmra.mxu0 %vm256_vm0, %v248_v2  ;;  %v282_v12 = vld [vmem:[#allocation2] sm:$0xff] }
  0x29   : > { %v291_v23 = vld [vmem:[#allocation3] sm:$0xff] }
  0xa5   : > { %v272_v5 = vpop.f32.mrf.mxu0 }
  0xa6   : > { %v276_v6 = vmul.f32 2.0, %v272_v5 }
  0xa8   : > { %v281_v7 = vsub.f32 %v276_v6, %v506_v4 }
  0xaa   : > { %v284_v8 = vsel %vm283_vm2, %v281_v7, -inf }
  0xab   : > { %285 = vmax.xlane.f32.xlu0 %v284_v8 }
  0xad   : > { %v274_v9 = vpop.f32.mrf.mxu0 }
 0x11e   : > { %v286_v13 = vpop.xlane.xlu0 %285 }
 0x11f   : > { %v287_v14 = vmax.f32 %v282_v12, %v286_v13 }
 0x121   : > { %v288_v15 = vsub.f32 %v282_v12, %v287_v14  ;;  %307 = vst.msk [vmem:[#allocation2] sm:$0xff] %vm245_vm1, %v287_v14  ;;  %295 = vperm.xlu0 %505, %v287_v14  }
 0x123   : > { %v289_v21 = vmul.f32 1.442695, %v288_v15 }
 0x128   : > { %v311_v30 = vld [vmem:[#allocation2] sm:$0xff] }
 0x193   : > { %v296_v16 = vpop.permute.xlu0 %295 }
 0x194   : > { %v298_v17 = vsub.f32 %v281_v7, %v296_v16 }
 0x196   : > { %v299_v18 = vmul.f32 1.442695, %v298_v17 }
 0x198   : > { %507 = vpow2.f32 %v299_v18 }
 0x199   : > { %509 = vpow2.f32 %v289_v21 }
 0x19e   : > { %v508_v19 = vpop.eup %507 }
 0x19f   : > { %v301_v20 = vsel %vm283_vm2, %v508_v19, 0.0  ;;  %v510_v22 = vpop.eup %509 }
 0x1a0   : > { %302 = vadd.xlane.f32.xlu1 %v301_v20  ;;  %v292_v24 = vmul.f32 %v510_v22, %v291_v23 }
 0x213   : > { %v303_v25 = vpop.xlane.xlu1 %302 }
 0x214   : > { %v304_v26 = vadd.f32 %v303_v25, %v292_v24 }
 0x216   : > { %306 = vst.msk [vmem:[#allocation3] sm:$0xff] %vm245_vm1, %v304_v26 }
 0x21d   : > { %v312_v27 = vld [vmem:[#allocation3] sm:$0xff] }
 0x21e   : > { %511 = vlog2.f32 %v312_v27 }
 0x224   : > { %v512_v28 = vpop.eup %511 }
 0x225   : > { %v314_v29 = vmul.f32 0.6931472, %v512_v28 }
 0x227   : > { %v315_v31 = vadd.f32 %v314_v29, %v311_v30 }
 0x229   : > { %316 = vst.msk [vmem:[%s239_s5] sm:$0xff] %vm245_vm1, %v315_v31 }
 0x22a PF: > { %s17_s17 = sadd.s32 1, %s627_s17   ;;  %s787_s12 = smov %s611_s13 }
 0x22b   : > { %p14_p2 = scmp.ge.s32.totalorder %s17_s17, 4   ;;  %s788_s13 = smov %s615_s14 }
 0x22c   : > { %s789_s14 = smov %s727_s8  ;;  %s790_s15 = smov %s623_s16 }
 0x22d   : > { %s791_s16 = smov %s793_s28  ;;  %16 = sbr.rel (!%p14_p2) target bundleno = 5 (0x5), region = 88 }
 0x232   :  { %336 = vsyncpa [#allocation5], 1 }
 0x233   :  { %338 = vsyncpa [#allocation5 + $0x1], 1 }
 0x234   :  { %339 = vsyncpa [#allocation7], 1 }

</bundles_post_ra>
